<compile_context>
chip_gen: v7x
topology: tpu7x:2x2x1
jax: 0.10.0
libtpu: 0.0.40
codegen_flags: <defaults>
</compile_context>

<pallas_src>
import jax
import jax.numpy as jnp
from jax.experimental import pallas as pl
from jax.experimental.pallas import tpu as pltpu

R_GAS = 8.31446261815324  # scipy.constants.R


def _round_up(x, m):
    return ((x + m - 1) // m) * m


def _deltag_kernel(temp_ref, dG_ref, kint_ref, tcol_ref, xT_ref, outT_ref, up_ref):
    """Grid = (n_pep_tiles,). One step writes out.T[:, tile_j] (lane-dense).

    Per-block refs:
      temp_ref : SMEM (1,)              temperature
      dG_ref   : VMEM (B, N_res)        deltaG candidates (lane dense rows)
      kint_ref : VMEM (1, N_res)        intrinsic exchange rates (row vector)
      tcol_ref : VMEM (N_t, 1)          timepoints as a column
      xT_ref   : VMEM (N_res, TN)       pre-transposed coupling-matrix tile (lanes = peptides)
      outT_ref : VMEM (B*N_t, TN)       transposed output tile, batch folded into M
      up_ref   : VMEM (B*N_t, N_res)    scratch: folded uptake.T (x_dtype, cast once on write)
    """
    n_t = tcol_ref.shape[0]
    B = dG_ref.shape[0]

    # Cold-ish path, recomputed per peptide tile so the grid axis carries no state
    # (keeps it "parallel" for v7x's two TensorCores). All math in f32 (v5e-safe).
    inv_rt = 1.0 / (R_GAS * temp_ref[0])                               # scalar, hoisted
    pfact = jnp.exp(dG_ref[...] * inv_rt)                              # (B, N_res)
    rate = kint_ref[...] * pl.reciprocal(1.0 + pfact, approx=False)    # (B, N_res)
    t_col = tcol_ref[...]                                              # (N_t, 1)

    # Fold batch into the M dimension: rows [b*N_t, (b+1)*N_t) hold batch element b.
    # Static Python loop (B is small); offsets are static -> plain aligned stores.
    # NOTE: -jnp.expm1(-kt) is numerically nicer for tiny k*t; kept as 1 - exp(-kt)
    # to mirror the torch reference exactly.
    for b in range(B):
        kt = rate[b:b + 1, :] * t_col                                  # (N_t, N_res)
        up_ref[pl.ds(b * n_t, n_t), :] = (1.0 - jnp.exp(-kt)).astype(up_ref.dtype)

    # Hot path: (B*N_t, N_res) @ (N_res, TN) on the MXU; TN-wide lane-dense store.
    outT_ref[...] = jnp.dot(
        up_ref[...], xT_ref[...], preferred_element_type=jnp.float32,
    ).astype(outT_ref.dtype)


def deltag_fit_forward_batched(temperature, deltaG_batch, X, k_int, timepoints,
                               *, pep_tile=512, x_dtype=jnp.float32,
                               return_transposed=False):
    """Batched forward: deltaG_batch is (B, N_res).

    Returns (B, N_pep, N_t), or the lane-dense (B, N_t, N_pep) when
    return_transposed=True (avoids the extra XLA transpose outside the kernel).
    """
    B, n_res = deltaG_batch.shape
    n_pep = X.shape[0]
    n_t = timepoints.shape[-1]

    # --- Layout plumbing (wrapper only, outside the hot kernel) -----------------
    # Peptide dim is always padded to a multiple of 256 lanes (MXU width on
    # v6e/v7x, 2x the 128-lane vreg): zero columns cost nothing and keep every
    # store unmasked. Tile = min(pep_tile, padded width).
    lane_align = 256
    pep_tile = max(lane_align, _round_up(pep_tile, lane_align))
    tn = min(pep_tile, _round_up(n_pep, lane_align))
    n_pep_p = _round_up(n_pep, tn)

    xT = jnp.swapaxes(X, 0, 1).astype(x_dtype)                     # (N_res, N_pep)
    if n_pep_p != n_pep:
        xT = jnp.pad(xT, ((0, 0), (0, n_pep_p - n_pep)))           # zero cols -> zero outputs

    dG = deltaG_batch.reshape(B, n_res).astype(jnp.float32)        # (B, N_res), lane dense
    kint_row = k_int.reshape(1, n_res).astype(jnp.float32)         # (1, N_res)
    t_col = timepoints.reshape(n_t, 1).astype(jnp.float32)         # (N_t, 1)
    temp = jnp.asarray(temperature, jnp.float32).reshape(1)        # (1,)

    grid = (n_pep_p // tn,)

    # --- VMEM budget (raise the scoped limit only when actually needed) ---------
    x_itemsize = jnp.dtype(x_dtype).itemsize
    budget = (2 * n_res * tn * x_itemsize              # double-buffered xT tile
              + 2 * B * n_t * tn * 4                   # double-buffered outT tile
              + B * n_t * n_res * x_itemsize           # uptake scratch
              + 2 * (B * n_res + n_res + n_t) * 4)     # small resident inputs
    vmem_limit = None
    if budget > 12 * 1024 * 1024:
        vmem_limit = min(int(budget * 3 // 2), 64 * 1024 * 1024)

    outT = pl.pallas_call(
        _deltag_kernel,
        out_shape=jax.ShapeDtypeStruct((B * n_t, n_pep_p), jnp.float32),
        grid_spec=pltpu.PrefetchScalarGridSpec(
            num_scalar_prefetch=0,
            grid=grid,
            in_specs=[
                pl.BlockSpec(memory_space=pltpu.MemorySpace.SMEM),   # temperature (1,)
                pl.BlockSpec((B, n_res), lambda j: (0, 0)),          # deltaG   (B, N_res)
                pl.BlockSpec((1, n_res), lambda j: (0, 0)),          # k_int    (1, N_res)
                pl.BlockSpec((n_t, 1), lambda j: (0, 0)),            # timepts  (N_t, 1)
                pl.BlockSpec((n_res, tn), lambda j: (0, j)),         # X.T      (N_res, N_pep_p)
            ],
            out_specs=pl.BlockSpec((B * n_t, tn), lambda j: (0, j)),
            scratch_shapes=[pltpu.VMEM((B * n_t, n_res), x_dtype)],  # folded uptake.T
        ),
        compiler_params=pltpu.CompilerParams(
            # Single peptide-tile axis, no carried state -> fully parallel
            # (sharded across v7x's two TensorCores; harmless on v5e/v6e).
            dimension_semantics=("parallel",),
            vmem_limit_bytes=vmem_limit,
        ),
    )(temp, dG, kint_row, t_col, xT)

    outT = outT.reshape(B, n_t, n_pep_p)[:, :, :n_pep]              # (B, N_t, N_pep)
    if return_transposed:
        return outT
    return jnp.swapaxes(outT, 1, 2)                                 # (B, N_pep, N_t)


def deltag_fit_forward(temperature, deltaG, X, k_int, timepoints,
                       *, pep_tile=512, x_dtype=jnp.float32):
    """Module-equivalent forward.

    temperature (1,), deltaG (N_res, 1), X (N_pep, N_res), k_int (N_res, 1),
    timepoints (1, N_t)  ->  (N_pep, N_t)
    """
    out = deltag_fit_forward_batched(
        temperature, deltaG.reshape(1, -1), X, k_int, timepoints,
        pep_tile=pep_tile, x_dtype=x_dtype)
    return out[0]


def deltag_fit_reference(temperature, deltaG, X, k_int, timepoints):
    pfact = jnp.exp(deltaG / (R_GAS * temperature[0]))
    uptake = 1.0 - jnp.exp(-jnp.matmul(k_int / (1.0 + pfact), timepoints))
    return jnp.matmul(X, uptake)


if __name__ == "__main__":
    key = jax.random.PRNGKey(0)
    k_dg, k_x, k_ki = jax.random.split(key, 3)

    N_PEPTIDES, N_RESIDUES, N_TIMEPOINTS, BATCH = 256, 32, 16, 4

    # Batch of candidate deltaG parameter vectors (J/mol scale); element 0 plays the
    # role of the module's learnable tensor for the single-forward check.
    deltaG_batch = jax.random.uniform(
        k_dg, (BATCH, N_RESIDUES), jnp.float32, minval=10_000.0, maxval=40_000.0)
    deltaG = deltaG_batch[0].reshape(N_RESIDUES, 1)

    temperature = jnp.array([300.0], dtype=jnp.float32)                 # (1,)
    X = jax.random.uniform(k_x, (N_PEPTIDES, N_RESIDUES), jnp.float32)
    k_int = jax.random.uniform(
        k_ki, (N_RESIDUES, 1), jnp.float32, minval=0.1, maxval=10.0)
    timepoints = jnp.linspace(0.0, 100.0, N_TIMEPOINTS, dtype=jnp.float32).reshape(1, -1)

    # 1) Module-equivalent single forward (f32), strict tolerance.
    out = jax.block_until_ready(
        deltag_fit_forward(temperature, deltaG, X, k_int, timepoints))
    ref = deltag_fit_reference(temperature, deltaG, X, k_int, timepoints)
    assert out.shape == (N_PEPTIDES, N_TIMEPOINTS)
    assert jnp.allclose(out, ref, rtol=1e-5, atol=1e-5), "single forward mismatch"

    # 2) Batched evaluation: many deltaG candidates folded into the MXU M dim of a
    #    single pallas_call (X.T streamed from HBM once for the whole batch).
    out_b = jax.block_until_ready(
        deltag_fit_forward_batched(temperature, deltaG_batch, X, k_int, timepoints))
    ref_b = jnp.stack([
        deltag_fit_reference(temperature, deltaG_batch[b].reshape(-1, 1),
                             X, k_int, timepoints)
        for b in range(BATCH)])
    assert out_b.shape == (BATCH, N_PEPTIDES, N_TIMEPOINTS)
    assert jnp.allclose(out_b, ref_b, rtol=1e-5, atol=1e-5), "batched forward mismatch"

    # 2b) Lane-dense transposed output path (no wrapper transpose).
    out_bT = jax.block_until_ready(
        deltag_fit_forward_batched(temperature, deltaG_batch, X, k_int, timepoints,
                                   return_transposed=True))
    assert out_bT.shape == (BATCH, N_TIMEPOINTS, N_PEPTIDES)
    assert jnp.allclose(jnp.swapaxes(out_bT, 1, 2), ref_b, rtol=1e-5, atol=1e-5), \
        "transposed output mismatch"

    # 3) bf16-X variant (halved X bandwidth / 2x MXU on v6e & v7x), f32 elementwise
    #    math + f32 accumulation; validated at a bf16-appropriate tolerance.
    out_bf16 = jax.block_until_ready(
        deltag_fit_forward(temperature, deltaG, X, k_int, timepoints,
                           x_dtype=jnp.bfloat16))
    assert jnp.allclose(out_bf16, ref, rtol=2e-2, atol=2e-2), "bf16 forward mismatch"

    print("KERNEL_OK")
</pallas_src>

<mosaic_0001>
module attributes {stable_mosaic.version = 11 : i64} {
  func.func @_deltag_kernel(%arg0: i32, %arg1: memref<1xf32, #tpu.memory_space<smem>>, %arg2: memref<1x32xf32, #tpu.memory_space<vmem>>, %arg3: memref<1x32xf32, #tpu.memory_space<vmem>>, %arg4: memref<16x1xf32, #tpu.memory_space<vmem>>, %arg5: memref<32x256xf32, #tpu.memory_space<vmem>>, %arg6: memref<16x256xf32, #tpu.memory_space<vmem>>, %arg7: memref<16x32xf32, #tpu.memory_space<vmem>>) attributes {dimension_semantics = [#tpu.dimension_semantics<parallel>], iteration_bounds = array<i64: 1>, scalar_prefetch = 0 : i64, scratch_operands = 1 : i64, tpu.core_type = #tpu.core_type<tc>, window_params = [{transform_indices = @transform_0, window_bounds = array<i64: 1>}, {pipeline_mode = #tpu.pipeline_mode<synchronous>, transform_indices = @transform_1, window_bounds = array<i64: 1, 32>}, {pipeline_mode = #tpu.pipeline_mode<synchronous>, transform_indices = @transform_2, window_bounds = array<i64: 1, 32>}, {pipeline_mode = #tpu.pipeline_mode<synchronous>, transform_indices = @transform_3, window_bounds = array<i64: 16, 1>}, {transform_indices = @transform_4, window_bounds = array<i64: 32, 256>}, {transform_indices = @transform_5, window_bounds = array<i64: 16, 256>}]} {
    %c0 = arith.constant 0 : index
    %0 = memref.load %arg1[%c0] : memref<1xf32, #tpu.memory_space<smem>>
    %cst = arith.constant 8.31446266 : f32
    %1 = arith.mulf %cst, %0 : f32
    %cst_0 = arith.constant 1.000000e+00 : f32
    %2 = arith.divf %cst_0, %1 : f32
    %c0_1 = arith.constant 0 : index
    %c0_2 = arith.constant 0 : index
    %3 = vector.load %arg2[%c0_1, %c0_2] : memref<1x32xf32, #tpu.memory_space<vmem>>, vector<1x32xf32>
    %4 = vector.broadcast %2 : f32 to vector<1x32xf32>
    %5 = arith.mulf %3, %4 : vector<1x32xf32>
    %6 = math.exp %5 : vector<1x32xf32>
    %c0_3 = arith.constant 0 : index
    %c0_4 = arith.constant 0 : index
    %7 = vector.load %arg3[%c0_3, %c0_4] : memref<1x32xf32, #tpu.memory_space<vmem>>, vector<1x32xf32>
    %cst_5 = arith.constant 1.000000e+00 : f32
    %8 = vector.broadcast %cst_5 : f32 to vector<1x32xf32>
    %9 = arith.addf %8, %6 : vector<1x32xf32>
    %10 = tpu.reciprocal %9 : vector<1x32xf32> -> vector<1x32xf32>
    %11 = arith.mulf %7, %10 : vector<1x32xf32>
    %c0_6 = arith.constant 0 : index
    %c0_7 = arith.constant 0 : index
    %12 = vector.load %arg4[%c0_6, %c0_7] : memref<16x1xf32, #tpu.memory_space<vmem>>, vector<16x1xf32>
    %13 = vector.broadcast %11 : vector<1x32xf32> to vector<16x32xf32>
    %14 = vector.broadcast %12 : vector<16x1xf32> to vector<16x32xf32>
    %15 = arith.mulf %13, %14 : vector<16x32xf32>
    %cst_8 = arith.constant 0.000000e+00 : f32
    %16 = vector.broadcast %cst_8 : f32 to vector<16x32xf32>
    %17 = arith.subf %16, %15 : vector<16x32xf32>
    %18 = math.exp %17 : vector<16x32xf32>
    %cst_9 = arith.constant 1.000000e+00 : f32
    %19 = vector.broadcast %cst_9 : f32 to vector<16x32xf32>
    %20 = arith.subf %19, %18 : vector<16x32xf32>
    %c0_10 = arith.constant 0 : index
    %c0_11 = arith.constant 0 : index
    %21 = vector.load %arg7[%c0_10, %c0_11] : memref<16x32xf32, #tpu.memory_space<vmem>>, vector<16x32xf32>
    tpu.vector_store %arg7[%c0_10, %c0_11], %20 {strides = array<i32>} : memref<16x32xf32, #tpu.memory_space<vmem>>, vector<16x32xf32>,
    %c0_12 = arith.constant 0 : index
    %c0_13 = arith.constant 0 : index
    %22 = vector.load %arg7[%c0_12, %c0_13] : memref<16x32xf32, #tpu.memory_space<vmem>>, vector<16x32xf32>
    %c0_14 = arith.constant 0 : index
    %c0_15 = arith.constant 0 : index
    %23 = vector.load %arg5[%c0_14, %c0_15] : memref<32x256xf32, #tpu.memory_space<vmem>>, vector<32x256xf32>
    %cst_16 = arith.constant dense<0.000000e+00> : vector<16x256xf32>
    %24 = tpu.matmul %22, %23, %cst_16 {dimension_numbers = #tpu.dot_dimension_numbers<[1], [0], [0], [1], [0, 0, 1, 1], [], []>} : vector<16x32xf32>, vector<32x256xf32>, vector<16x256xf32> -> vector<16x256xf32>
    %c0_17 = arith.constant 0 : index
    %c0_18 = arith.constant 0 : index
    %25 = vector.load %arg6[%c0_17, %c0_18] : memref<16x256xf32, #tpu.memory_space<vmem>>, vector<16x256xf32>
    tpu.vector_store %arg6[%c0_17, %c0_18], %24 {strides = array<i32>} : memref<16x256xf32, #tpu.memory_space<vmem>>, vector<16x256xf32>,
    return
  }
  func.func @transform_0(%arg0: i32) -> i32 {
    %c0_i32 = arith.constant 0 : i32
    %c0_i32_0 = arith.constant 0 : i32
    return %c0_i32 : i32
  }
  func.func @transform_1(%arg0: i32) -> (i32, i32) {
    %c0_i32 = arith.constant 0 : i32
    %c0_i32_0 = arith.constant 0 : i32
    %c0_i32_1 = arith.constant 0 : i32
    return %c0_i32, %c0_i32_0 : i32, i32
  }
  func.func @transform_2(%arg0: i32) -> (i32, i32) {
    %c0_i32 = arith.constant 0 : i32
    %c0_i32_0 = arith.constant 0 : i32
    %c0_i32_1 = arith.constant 0 : i32
    return %c0_i32, %c0_i32_0 : i32, i32
  }
  func.func @transform_3(%arg0: i32) -> (i32, i32) {
    %c0_i32 = arith.constant 0 : i32
    %c0_i32_0 = arith.constant 0 : i32
    %c0_i32_1 = arith.constant 0 : i32
    return %c0_i32, %c0_i32_0 : i32, i32
  }
  func.func @transform_4(%arg0: i32) -> (i32, i32) {
    %c0_i32 = arith.constant 0 : i32
    %c0_i32_0 = arith.constant 0 : i32
    return %c0_i32, %arg0 : i32, i32
  }
  func.func @transform_5(%arg0: i32) -> (i32, i32) {
    %c0_i32 = arith.constant 0 : i32
    %c0_i32_0 = arith.constant 0 : i32
    return %c0_i32, %arg0 : i32, i32
  }
}

</mosaic_0001>

<bundles_post_ra>
// kernel: tpu_custom_call.1
= control target key start
LH: loop header
LB: loop body
LE: loop exit
PB: predicated region body
PF: predicated region fallthrough
CT: control target
= control target key end

     0   :  { %11 = vsyncpa [#allocation5], 0  ;;  %s357_s0 = inlined_call_operand.<no memory space> [shape: f32[1], index: 0, kind: input, shape index: {}]   ;;  %s358_s1 = inlined_call_operand.vmem [shape: f32[1,32], index: 1, kind: input, shape index: {}]   ;;  %s359_s2 = inlined_call_operand.vmem [shape: f32[1,32], index: 2, kind: input, shape index: {}]   ;;  %s360_s3 = inlined_call_operand.vmem [shape: f32[16,1], index: 3, kind: input, shape index: {}]   ;;  %s361_s4 = inlined_call_operand.hbm [shape: f32[32,256], index: 4, kind: input, shape index: {}]   ;;  %s362_s5 = inlined_call_operand.hbm [shape: f32[16,256], index: 5, kind: output, shape index: {}]  }
   0x1   :  { %12 = vsyncpa [#allocation6], 0  ;;  %s276_s18 = smov [#allocation4]   ;;  %s228_s22 = scalar_lea.hbm %s361_s4, 1024 }
   0x2   :  { %s26_s19 = sshll.u32 %s276_s18, 4  ;;  %p229_p0 = scmp.ne.s32.totalorder %s361_s4, %s228_s22  ;;  %s27_s19 = int_to_ptr.vmem [resolvable:$true] %s26_s19 }
   0x3   :  { %p232_p1 = scmp.lt.u32.totalorder %s228_s22, %s361_s4 }
   0x5   :  { %p234_p2 = pnand %p232_p1, %p229_p0 }
   0x7   :  { %237 = shalt.err (!%p234_p2)
}
   0x8   :  { %s238_s27 = scalar_lea.vmem %s27_s19, 1024  ;;  %p243_p4 = scmp.lt.s32.totalorder %s27_s19, %s27_s19 }
   0x9   :  { %p239_p3 = scmp.ne.s32.totalorder %s27_s19, %s238_s27  ;;  %p244_p5 = scmp.lt.s32.totalorder %s238_s27, %s238_s27 }
   0xb   :  { %p245_p6 = por %p244_p5, %p243_p4 }
   0xd   :  { %p246_p7 = pnand %p245_p6, %p239_p3 }
   0xf   :  { %249 = shalt.err (!%p246_p7)
}
  0x10   :  { %s277_s28 = smov 256   ;;  %s278_s29 = smov 16  }
  0x11   :  { %32 = dma.hbm_to_vmem [thread:$0]  %s361_s4, 1024, %s27_s19, [#allocation5], %s277_s28, %s277_s28, %s278_s29  }
  0x12   :  { %272 = dma.done.wait [#allocation5], 1024  }
  0x13   :  { %273 = vsyncadd [#allocation5], 4294966272  ;;  %s37_s9 = smul.f32 8.314463, %s357_s0  ;;  %v279_v0 = vmov 0   ;;  %v50_v2 = vld [vmem:[%s360_s3] sm:$0xff]  ;;  %v53_v24 = vlaneseq }
  0x14   :  { %217 = vset.pattern.permute.xlu0 %v279_v0  ;;  %v51_v3 = vld [vmem:[%s360_s3 + $0x8] sm:$0xff]  ;;  %v84_v5 = vld [vmem:[#allocation4 + $0x8] sm:$0xff]  ;;  %v83_v8 = vld [vmem:[#allocation4] sm:$0xff]  ;;  %v280_v17 = vmov 0.0   ;;  %vm78_vm0 = vcmask 261120  }
  0x15   :  { %v38_v1 = vstv %s37_s9  ;;  %60 = vperm.xlu0 %217, %v50_v2   ;;  %v86_v6 = vld [vmem:[#allocation4 + $0x18] sm:$0xff]  ;;  %v85_v9 = vld [vmem:[#allocation4 + $0x10] sm:$0xff]  ;;  %v88_v11 = vld [vmem:[#allocation4 + $0x28] sm:$0xff]  ;;  %161 = vmatprep.mubr.f32.mxu0 %v280_v17  ;;  %v54_v25 = vshrl.u32 %v53_v24, 7 }
  0x16   :  { %218 = vrcp.f32 %v38_v1  ;;  %v197_v7 = vpack.c.bf16 %v86_v6, %v84_v5  ;;  %v199_v10 = vpack.c.bf16 %v85_v9, %v83_v8  ;;  %v90_v12 = vld [vmem:[#allocation4 + $0x38] sm:$0xff]  ;;  %v87_v14 = vld [vmem:[#allocation4 + $0x20] sm:$0xff]  ;;  %v89_v15 = vld [vmem:[#allocation4 + $0x30] sm:$0xff]  ;;  %167 = vmatprep.mubr.f32.mxu1 %v280_v17 }
  0x17   :  { %v201_v13 = vpack.c.bf16 %v90_v12, %v88_v11  ;;  %v203_v16 = vpack.c.bf16 %v89_v15, %v87_v14  ;;  %v41_v18 = vld [vmem:[%s358_s1] sm:$0x1]  ;;  %v55_v28 = vsub.s32 0, %v54_v25  ;;  %s281_s1 = smov [#allocation7]  }
  0x18   :  { %198 = vmatprep.subr.bf16.mxu0 %v197_v7  ;;  %205 = vmatprep.subr.bf16.mxu1 %v197_v7  ;;  %v46_v27 = vld [vmem:[%s359_s2] sm:$0x1]  ;;  %s183_s2 = sshll.u32 %s281_s1, 4  ;;  %s184_s2 = int_to_ptr.vmem [resolvable:$true] %s183_s2 }
  0x19   :  { %65 = vperm.xlu0 %217, %v51_v3   ;;  %200 = vmatpush1.bf16.msra.mxu0 %v199_v10  ;;  %s250_s16 = scalar_lea.vmem %s184_s2, 512  ;;  %p255_p9 = scmp.lt.s32.totalorder %s184_s2, %s184_s2 }
  0x1a   :  { %207 = vmatpush1.bf16.msra.mxu1 %v199_v10  ;;  %202 = vmatprep.subr.bf16.mxu0 %v201_v13  ;;  %p251_p8 = scmp.ne.s32.totalorder %s184_s2, %s250_s16  ;;  %p256_p10 = scmp.lt.s32.totalorder %s250_s16, %s250_s16 }
  0x1b   :  { %206 = vmatprep.subr.bf16.mxu1 %v201_v13 }
  0x1c   :  { %p257_p11 = por %p256_p10, %p255_p9 }
  0x1d   :  { %204 = vmatpush1.bf16.msra.mxu0 %v203_v16 }
  0x1e   :  { %208 = vmatpush1.bf16.msra.mxu1 %v203_v16  ;;  %p258_p12 = pnand %p257_p11, %p251_p8 }
  0x20   :  { %v219_v4 = vpop.eup %218 }
  0x21   :  { %209 = vpush %v219_v4 }
  0x52   :  { %s210_s0 = spop %209 }
  0x53   :  { %v42_v19 = vstv %s210_s0 }
  0x54   :  { %v43_v20 = vmul.f32 %v42_v19, %v41_v18 }
  0x56   :  { %v44_v21 = vmul.f32 1.442695, %v43_v20 }
  0x58   :  { %220 = vpow2.f32 %v44_v21 }
  0x62   :  { %v221_v22 = vpop.eup %220 }
  0x63   :  { %v47_v23 = vadd.f32 1.0, %v221_v22 }
  0x65   :  { %222 = vrcp.f32 %v47_v23 }
  0x6f   :  { %v223_v26 = vpop.eup %222 }
  0x70   :  { %v49_v29 = vmul.f32 %v223_v26, %v46_v27 }
  0x72   :  { %v56_v30 = vrot.slane %v49_v29, %v55_v28 }
  0x94   :  { %v61_v31 = vpop.permute.xlu0 %60 }
  0x95   :  { %v68_v32 = vmul.f32 %v61_v31, %v56_v30 }
  0x97   :  { %v70_v33 = vsub.f32 0.0, %v68_v32 }
  0x98   :  { %v66_v34 = vpop.permute.xlu0 %65 }
  0x99   :  { %v72_v35 = vmul.f32 1.442695, %v70_v33  ;;  %v69_v36 = vmul.f32 %v66_v34, %v56_v30 }
  0x9b   :  { %224 = vpow2.f32 %v72_v35  ;;  %v71_v37 = vsub.f32 0.0, %v69_v36 }
  0x9d   :  { %v74_v38 = vmul.f32 1.442695, %v71_v37 }
  0x9f   :  { %226 = vpow2.f32 %v74_v38 }
  0xa5   :  { %v225_v39 = vpop.eup %224 }
  0xa6   :  { %v76_v40 = vsub.f32 1.0, %v225_v39 }
  0xa8   :  { %79 = vst.msk [vmem:[#allocation2] sm:$0xff] %vm78_vm0, %v76_v40 }
  0xa9   :  { %v227_v41 = vpop.eup %226 }
  0xaa   :  { %v77_v42 = vsub.f32 1.0, %v227_v41 }
  0xac   :  { %80 = vst.msk [vmem:[#allocation2 + $0x8] sm:$0xff] %vm78_vm0, %v77_v42 }
  0xaf   :  { %v81_v43 = vld [vmem:[#allocation2] sm:$0xff] }
  0xb0   :  { %195 = vmatmul.mubr.msk.f32.vlgmr.msra.gmra.mrb[0].mxu0 %vm78_vm0, %v81_v43 }
  0xb3   :  { %v82_v44 = vld [vmem:[#allocation2 + $0x8] sm:$0xff] }
  0xb4   :  { %196 = vmatmul.mubr.msk.f32.vlgmr.msra.gmra.mrb[0].mxu1 %vm78_vm0, %v82_v44 }
 0x183   :  { %v163_v45 = vpop.f32.mrb[0].mxu0 }
 0x184   :  { %174 = vst [vmem:[#allocation7] sm:$0xff] %v163_v45  ;;  %v165_v46 = vpop.f32.mrb[1].mxu0 }
 0x185   :  { %175 = vst [vmem:[#allocation7 + $0x8] sm:$0xff] %v165_v46 }
 0x187   :  { %v169_v47 = vpop.f32.mrb[0].mxu1 }
 0x188   :  { %176 = vst [vmem:[#allocation7 + $0x10] sm:$0xff] %v169_v47  ;;  %v171_v48 = vpop.f32.mrb[1].mxu1 }
 0x189   :  { %177 = vst [vmem:[#allocation7 + $0x18] sm:$0xff] %v171_v48 }
 0x18a   :  { %261 = shalt.err (!%p258_p12)
}
 0x18b   :  { %s262_s19 = scalar_lea.hbm %s362_s5, 512 }
 0x18c   :  { %p263_p13 = scmp.ne.s32.totalorder %s362_s5, %s262_s19  ;;  %p266_p0 = scmp.lt.u32.totalorder %s262_s19, %s362_s5 }
 0x18e   :  { %p268_p1 = pnand %p266_p0, %p263_p13 }
 0x190   :  { %271 = shalt.err (!%p268_p1)
}
 0x191   :  { %189 = dma.vmem_to_hbm [thread:$0]  %s184_s2, 512, %s362_s5, [#allocation6], %s277_s28, %s277_s28, %s278_s29  }
 0x192   :  { %274 = dma.done.wait [#allocation6], 512  }
 0x193   :  { %275 = vsyncadd [#allocation6], 4294966784 }
 0x194   :  { %193 = vsyncpa [#allocation5], 1 }
 0x195   :  { %194 = vsyncpa [#allocation6], 1 }

</bundles_post_ra>
